<compile_context>
chip_gen: v5e
topology: v5e:2x2
jax: 0.10.0
libtpu: 0.0.40
codegen_flags: <defaults>
</compile_context>

<pallas_src>
import functools

import jax
import jax.numpy as jnp
from jax.experimental import pallas as pl
from jax.experimental.pallas import tpu as pltpu

HIDDEN = 240        # logical hidden width (matches the PyTorch module)
HIDDEN_PAD = 256    # lane-aligned hidden width used inside the kernel
OUT_PAD = 8         # padded MXU output width for the last layer (col 0 is real)


def _disc_kernel(x_ref, w1_ref, b1_ref, w2_ref, b2_ref, w3_ref, b3_ref, o_ref):
    # One batch tile per grid step; all (tiny, padded) weights resident in VMEM.
    # Weights arrive as bf16; activations are cast to bf16 only at the dot inputs,
    # accumulation and all elementwise work stay in f32.
    x = x_ref[...].astype(jnp.bfloat16)

    h = jnp.dot(x, w1_ref[...], preferred_element_type=jnp.float32) + b1_ref[...]
    h = jnp.maximum(h, 0.0)                                           # ReLU (f32)

    h = jnp.dot(h.astype(jnp.bfloat16), w2_ref[...],
                preferred_element_type=jnp.float32) + b2_ref[...]
    h = jnp.maximum(h, 0.0)                                           # ReLU (f32)

    z = jnp.dot(h.astype(jnp.bfloat16), w3_ref[...],
                preferred_element_type=jnp.float32) + b3_ref[...]     # (bb, OUT_PAD)

    # Sigmoid = reciprocal(1 + exp(-z)); exp and approx-reciprocal both go to the EUP.
    p = pl.reciprocal(1.0 + jnp.exp(-z), approx=True)

    # Store only the real column -> (bb, 1) output block; masked vst, but the saved
    # HBM bytes (4 B/row vs 512 B/row previously) dominate.
    o_ref[...] = p[:, :1].astype(o_ref.dtype)


def _round_up(n, m):
    return ((n + m - 1) // m) * m


def _cdiv(a, b):
    return -(-a // b)


def _pad_to(a, shape):
    return jnp.pad(a, [(0, s - d) for d, s in zip(a.shape, shape)])


def _num_tensorcores_per_chip():
    """Best-effort chip-generation query: v7x has 2 TensorCores, v5e/v6e have 1."""
    try:
        kind = jax.devices()[0].device_kind.lower()
        if "v7" in kind or "tpu7" in kind:
            return 2
    except Exception:
        pass
    return 1


def _pick_block_b(batch, requested, n_tc):
    """Batch tile: multiple of 8; on multi-TC chips target >= 2 tiles per core,
    on single-TC chips never force a split (one tile for small batches)."""
    b8 = _round_up(batch, 8)
    bb = max(8, min(_round_up(requested, 8), b8))
    if n_tc > 1:
        min_steps = 2 * n_tc                      # >= 2 tiles per TensorCore
        if b8 >= 8 * min_steps:
            bb = min(bb, _round_up(_cdiv(b8, min_steps), 8))
            steps = _round_up(_cdiv(b8, bb), n_tc)  # keep cores balanced
            bb = _round_up(_cdiv(b8, steps), 8)
    b_pad = _round_up(b8, bb)
    return bb, b_pad


def prepare_params(params):
    """One-time glue (hoisted out of the forward): transpose PyTorch (out,in) weights
    to (in,out), zero-pad hidden 240->256 and output 1->OUT_PAD, cast weights to bf16.
    Zero-padded columns have zero bias -> ReLU(0)=0; zero rows of the next weight
    contribute nothing, so the logical result is unchanged."""
    pose_dim = params["w1"].shape[1]
    w1 = _pad_to(params["w1"].T, (pose_dim, HIDDEN_PAD)).astype(jnp.bfloat16)
    b1 = _pad_to(params["b1"].reshape(1, HIDDEN), (1, HIDDEN_PAD)).astype(jnp.float32)
    w2 = _pad_to(params["w2"].T, (HIDDEN_PAD, HIDDEN_PAD)).astype(jnp.bfloat16)
    b2 = _pad_to(params["b2"].reshape(1, HIDDEN), (1, HIDDEN_PAD)).astype(jnp.float32)
    w3 = _pad_to(params["w3"].T, (HIDDEN_PAD, OUT_PAD)).astype(jnp.bfloat16)
    b3 = _pad_to(params["b3"].reshape(1, 1), (1, OUT_PAD)).astype(jnp.float32)
    return {"w1": w1, "b1": b1, "w2": w2, "b2": b2, "w3": w3, "b3": b3}


@functools.partial(jax.jit, static_argnames=("block_b", "n_tc"))
def _forward_impl(x, prep, *, block_b, n_tc):
    B, pose_dim = x.shape
    bb, Bp = _pick_block_b(B, block_b, n_tc)

    # Only pad the batch if the chosen tile does not divide it (usually it does).
    x_p = jnp.pad(x, ((0, Bp - B), (0, 0))) if Bp != B else x

    grid = (Bp // bb,)
    rep = lambda i: (0, 0)  # weights/biases: constant index_map -> resident in VMEM

    out = pl.pallas_call(
        _disc_kernel,
        out_shape=jax.ShapeDtypeStruct((Bp, 1), jnp.float32),
        grid_spec=pltpu.PrefetchScalarGridSpec(
            num_scalar_prefetch=0,
            grid=grid,
            in_specs=[
                pl.BlockSpec((bb, pose_dim), lambda i: (i, 0)),        # x tile
                pl.BlockSpec((pose_dim, HIDDEN_PAD), rep),             # w1 (bf16)
                pl.BlockSpec((1, HIDDEN_PAD), rep),                    # b1 (f32)
                pl.BlockSpec((HIDDEN_PAD, HIDDEN_PAD), rep),           # w2 (bf16)
                pl.BlockSpec((1, HIDDEN_PAD), rep),                    # b2 (f32)
                pl.BlockSpec((HIDDEN_PAD, OUT_PAD), rep),              # w3 (bf16)
                pl.BlockSpec((1, OUT_PAD), rep),                       # b3 (f32)
            ],
            out_specs=pl.BlockSpec((bb, 1), lambda i: (i, 0)),         # narrow output
        ),
        compiler_params=pltpu.CompilerParams(
            dimension_semantics=("parallel",),
        ),
    )(x_p, prep["w1"], prep["b1"], prep["w2"], prep["b2"], prep["w3"], prep["b3"])

    return out if Bp == B else out[:B]


def discriminator_forward(x, prep, *, block_b=512):
    """x: (B, pose_dim) float32. prep: output of prepare_params()."""
    return _forward_impl(x, prep, block_b=block_b, n_tc=_num_tensorcores_per_chip())


def init_params(key, pose_dim):
    """Deterministic init mimicking PyTorch nn.Linear default (U(-1/sqrt(in), 1/sqrt(in)))."""
    ks = jax.random.split(key, 6)

    def lin(kw, kb, fan_in, fan_out):
        bound = 1.0 / jnp.sqrt(fan_in)
        w = jax.random.uniform(kw, (fan_out, fan_in), jnp.float32, -bound, bound)
        b = jax.random.uniform(kb, (fan_out,), jnp.float32, -bound, bound)
        return w, b

    w1, b1 = lin(ks[0], ks[1], pose_dim, HIDDEN)
    w2, b2 = lin(ks[2], ks[3], HIDDEN, HIDDEN)
    w3, b3 = lin(ks[4], ks[5], HIDDEN, 1)
    return {"w1": w1, "b1": b1, "w2": w2, "b2": b2, "w3": w3, "b3": b3}


def reference_forward(x, p):
    h = jnp.maximum(x @ p["w1"].T + p["b1"], 0.0)
    h = jnp.maximum(h @ p["w2"].T + p["b2"], 0.0)
    z = h @ p["w3"].T + p["b3"]
    return jax.nn.sigmoid(z)


if __name__ == "__main__":
    key = jax.random.PRNGKey(0)
    k_x, k_p = jax.random.split(key)

    pose_dim = 32
    batch = 64

    x = jax.random.normal(k_x, (batch, pose_dim), dtype=jnp.float32)
    params = init_params(k_p, pose_dim)
    prep = prepare_params(params)   # one-time weight transpose/pad/cast (hoisted)

    out = discriminator_forward(x, prep)
    out = jax.block_until_ready(out)

    ref = reference_forward(x, params)
    assert out.shape == (batch, 1)
    # bf16 MXU operands + approx reciprocal -> loosened tolerance vs f32 reference.
    assert jnp.allclose(out, ref, atol=2e-2, rtol=2e-2), "mismatch vs JAX reference"

    print("KERNEL_OK")
</pallas_src>

<mosaic_0001>
module attributes {stable_mosaic.version = 11 : i64} {
  func.func @_disc_kernel(%arg0: i32, %arg1: memref<64x32xf32, #tpu.memory_space<vmem>>, %arg2: memref<32x256xbf16, #tpu.memory_space<vmem>>, %arg3: memref<1x256xf32, #tpu.memory_space<vmem>>, %arg4: memref<256x256xbf16, #tpu.memory_space<vmem>>, %arg5: memref<1x256xf32, #tpu.memory_space<vmem>>, %arg6: memref<256x8xbf16, #tpu.memory_space<vmem>>, %arg7: memref<1x8xf32, #tpu.memory_space<vmem>>, %arg8: memref<64x1xf32, #tpu.memory_space<vmem>>) attributes {dimension_semantics = [#tpu.dimension_semantics<parallel>], iteration_bounds = array<i64: 1>, scalar_prefetch = 0 : i64, scratch_operands = 0 : i64, tpu.core_type = #tpu.core_type<tc>, window_params = [{transform_indices = @transform_0, window_bounds = array<i64: 64, 32>}, {pipeline_mode = #tpu.pipeline_mode<synchronous>, transform_indices = @transform_1, window_bounds = array<i64: 32, 256>}, {pipeline_mode = #tpu.pipeline_mode<synchronous>, transform_indices = @transform_2, window_bounds = array<i64: 1, 256>}, {pipeline_mode = #tpu.pipeline_mode<synchronous>, transform_indices = @transform_3, window_bounds = array<i64: 256, 256>}, {pipeline_mode = #tpu.pipeline_mode<synchronous>, transform_indices = @transform_4, window_bounds = array<i64: 1, 256>}, {pipeline_mode = #tpu.pipeline_mode<synchronous>, transform_indices = @transform_5, window_bounds = array<i64: 256, 8>}, {pipeline_mode = #tpu.pipeline_mode<synchronous>, transform_indices = @transform_6, window_bounds = array<i64: 1, 8>}, {transform_indices = @transform_7, window_bounds = array<i64: 64, 1>}]} {
    %c0 = arith.constant 0 : index
    %c0_0 = arith.constant 0 : index
    %0 = vector.load %arg1[%c0, %c0_0] : memref<64x32xf32, #tpu.memory_space<vmem>>, vector<64x32xf32>
    %1 = arith.truncf %0 : vector<64x32xf32> to vector<64x32xbf16>
    %c0_1 = arith.constant 0 : index
    %c0_2 = arith.constant 0 : index
    %2 = vector.load %arg2[%c0_1, %c0_2] : memref<32x256xbf16, #tpu.memory_space<vmem>>, vector<32x256xbf16>
    %cst = arith.constant dense<0.000000e+00> : vector<64x256xf32>
    %3 = tpu.matmul %1, %2, %cst {dimension_numbers = #tpu.dot_dimension_numbers<[1], [0], [0], [1], [0, 0, 1, 1], [], []>} : vector<64x32xbf16>, vector<32x256xbf16>, vector<64x256xf32> -> vector<64x256xf32>
    %c0_3 = arith.constant 0 : index
    %c0_4 = arith.constant 0 : index
    %4 = vector.load %arg3[%c0_3, %c0_4] : memref<1x256xf32, #tpu.memory_space<vmem>>, vector<1x256xf32>
    %5 = vector.broadcast %4 : vector<1x256xf32> to vector<64x256xf32>
    %6 = arith.addf %3, %5 : vector<64x256xf32>
    %cst_5 = arith.constant 0.000000e+00 : f32
    %7 = vector.broadcast %cst_5 : f32 to vector<64x256xf32>
    %8 = arith.maximumf %6, %7 : vector<64x256xf32>
    %9 = arith.truncf %8 : vector<64x256xf32> to vector<64x256xbf16>
    %c0_6 = arith.constant 0 : index
    %c0_7 = arith.constant 0 : index
    %10 = vector.load %arg4[%c0_6, %c0_7] : memref<256x256xbf16, #tpu.memory_space<vmem>>, vector<256x256xbf16>
    %cst_8 = arith.constant dense<0.000000e+00> : vector<64x256xf32>
    %11 = tpu.matmul %9, %10, %cst_8 {dimension_numbers = #tpu.dot_dimension_numbers<[1], [0], [0], [1], [0, 0, 1, 1], [], []>} : vector<64x256xbf16>, vector<256x256xbf16>, vector<64x256xf32> -> vector<64x256xf32>
    %c0_9 = arith.constant 0 : index
    %c0_10 = arith.constant 0 : index
    %12 = vector.load %arg5[%c0_9, %c0_10] : memref<1x256xf32, #tpu.memory_space<vmem>>, vector<1x256xf32>
    %13 = vector.broadcast %12 : vector<1x256xf32> to vector<64x256xf32>
    %14 = arith.addf %11, %13 : vector<64x256xf32>
    %cst_11 = arith.constant 0.000000e+00 : f32
    %15 = vector.broadcast %cst_11 : f32 to vector<64x256xf32>
    %16 = arith.maximumf %14, %15 : vector<64x256xf32>
    %17 = arith.truncf %16 : vector<64x256xf32> to vector<64x256xbf16>
    %c0_12 = arith.constant 0 : index
    %c0_13 = arith.constant 0 : index
    %18 = vector.load %arg6[%c0_12, %c0_13] : memref<256x8xbf16, #tpu.memory_space<vmem>>, vector<256x8xbf16>
    %cst_14 = arith.constant dense<0.000000e+00> : vector<64x8xf32>
    %19 = tpu.matmul %17, %18, %cst_14 {dimension_numbers = #tpu.dot_dimension_numbers<[1], [0], [0], [1], [0, 0, 1, 1], [], []>} : vector<64x256xbf16>, vector<256x8xbf16>, vector<64x8xf32> -> vector<64x8xf32>
    %c0_15 = arith.constant 0 : index
    %c0_16 = arith.constant 0 : index
    %20 = vector.load %arg7[%c0_15, %c0_16] : memref<1x8xf32, #tpu.memory_space<vmem>>, vector<1x8xf32>
    %21 = vector.broadcast %20 : vector<1x8xf32> to vector<64x8xf32>
    %22 = arith.addf %19, %21 : vector<64x8xf32>
    %cst_17 = arith.constant 0.000000e+00 : f32
    %23 = vector.broadcast %cst_17 : f32 to vector<64x8xf32>
    %24 = arith.subf %23, %22 : vector<64x8xf32>
    %25 = math.exp %24 : vector<64x8xf32>
    %cst_18 = arith.constant 1.000000e+00 : f32
    %26 = vector.broadcast %cst_18 : f32 to vector<64x8xf32>
    %27 = arith.addf %26, %25 : vector<64x8xf32>
    %28 = tpu.reciprocal %27 {approx = true} : vector<64x8xf32> -> vector<64x8xf32>
    %29 = vector.extract_strided_slice %28 {offsets = [0, 0], sizes = [64, 1], strides = [1, 1]} : vector<64x8xf32> to vector<64x1xf32>
    %c0_19 = arith.constant 0 : index
    %c0_20 = arith.constant 0 : index
    %30 = vector.load %arg8[%c0_19, %c0_20] : memref<64x1xf32, #tpu.memory_space<vmem>>, vector<64x1xf32>
    tpu.vector_store %arg8[%c0_19, %c0_20], %29 {strides = array<i32>} : memref<64x1xf32, #tpu.memory_space<vmem>>, vector<64x1xf32>,
    return
  }
  func.func @transform_0(%arg0: i32) -> (i32, i32) {
    %c0_i32 = arith.constant 0 : i32
    %c0_i32_0 = arith.constant 0 : i32
    return %arg0, %c0_i32 : i32, i32
  }
  func.func @transform_1(%arg0: i32) -> (i32, i32) {
    %c0_i32 = arith.constant 0 : i32
    %c0_i32_0 = arith.constant 0 : i32
    %c0_i32_1 = arith.constant 0 : i32
    return %c0_i32, %c0_i32_0 : i32, i32
  }
  func.func @transform_2(%arg0: i32) -> (i32, i32) {
    %c0_i32 = arith.constant 0 : i32
    %c0_i32_0 = arith.constant 0 : i32
    %c0_i32_1 = arith.constant 0 : i32
    return %c0_i32, %c0_i32_0 : i32, i32
  }
  func.func @transform_3(%arg0: i32) -> (i32, i32) {
    %c0_i32 = arith.constant 0 : i32
    %c0_i32_0 = arith.constant 0 : i32
    %c0_i32_1 = arith.constant 0 : i32
    return %c0_i32, %c0_i32_0 : i32, i32
  }
  func.func @transform_4(%arg0: i32) -> (i32, i32) {
    %c0_i32 = arith.constant 0 : i32
    %c0_i32_0 = arith.constant 0 : i32
    %c0_i32_1 = arith.constant 0 : i32
    return %c0_i32, %c0_i32_0 : i32, i32
  }
  func.func @transform_5(%arg0: i32) -> (i32, i32) {
    %c0_i32 = arith.constant 0 : i32
    %c0_i32_0 = arith.constant 0 : i32
    %c0_i32_1 = arith.constant 0 : i32
    return %c0_i32, %c0_i32_0 : i32, i32
  }
  func.func @transform_6(%arg0: i32) -> (i32, i32) {
    %c0_i32 = arith.constant 0 : i32
    %c0_i32_0 = arith.constant 0 : i32
    %c0_i32_1 = arith.constant 0 : i32
    return %c0_i32, %c0_i32_0 : i32, i32
  }
  func.func @transform_7(%arg0: i32) -> (i32, i32) {
    %c0_i32 = arith.constant 0 : i32
    %c0_i32_0 = arith.constant 0 : i32
    return %arg0, %c0_i32 : i32, i32
  }
}

</mosaic_0001>

<bundles_post_ra>
// kernel: _forward_impl.1
= control target key start
LH: loop header
LB: loop body
LE: loop exit
PB: predicated region body
PF: predicated region fallthrough
CT: control target
= control target key end

     0   :  { %12 = vsyncpa [#allocation3], 0  ;;  %s1092_s27 = smov [#allocation2]   ;;  %s1093_s29 = smov 128   ;;  %s1333_s0 = inlined_call_operand.vmem [shape: f32[64,32], index: 0, kind: input, shape index: {}]   ;;  %s1334_s1 = inlined_call_operand.vmem [shape: bf16[32,256], index: 1, kind: input, shape index: {}]   ;;  %s1335_s2 = inlined_call_operand.vmem [shape: f32[1,256], index: 2, kind: input, shape index: {}]   ;;  %s1336_s3 = inlined_call_operand.hbm [shape: bf16[256,256], index: 3, kind: input, shape index: {}]   ;;  %s1337_s4 = inlined_call_operand.vmem [shape: f32[1,256], index: 4, kind: input, shape index: {}]   ;;  %s1338_s5 = inlined_call_operand.vmem [shape: bf16[256,8], index: 5, kind: input, shape index: {}]   ;;  %s1339_s6 = inlined_call_operand.vmem [shape: f32[1,8], index: 6, kind: input, shape index: {}]   ;;  %s1340_s7 = inlined_call_operand.vmem [shape: f32[64,1], index: 7, kind: output, shape index: {}]  }
   0x1   :  { %s23_s26 = sshll.u32 %s1336_s3, 4  ;;  %s25_s28 = sshll.u32 %s1092_s27, 4  ;;  %s24_s26 = int_to_ptr.hbm [resolvable:$true] %s23_s26  ;;  %s26_s28 = int_to_ptr.vmem [resolvable:$true] %s25_s28 }
   0x2   :  { %s1094_s30 = smov 8  }
   0x3   :  { %31 = dma.hbm_to_vmem [thread:$0]  %s24_s26, 4096, %s26_s28, [#allocation3], %s1093_s29, %s1093_s29, %s1094_s30  }
   0x4   :  { %1090 = dma.done.wait [#allocation3], 4096  }
   0x5   :  { %1091 = vsyncadd [#allocation3], 4294963200  ;;  %v772_v0 = vld [vmem:[%s1334_s1 + $0x10] sm:$0xf]  ;;  %v981_v1 = vld [vmem:[%s1334_s1 + $0x14] sm:$0xf0] }
   0x6   :  { %v980_v2 = vld [vmem:[%s1334_s1 + $0x14] sm:$0xf]  ;;  %v773_v3 = vor.u32 %v981_v1, %v772_v0  ;;  %v774_v4 = vld [vmem:[%s1334_s1 + $0x18] sm:$0xf0]  ;;  %v764_v5 = vld [vmem:[%s1334_s1] sm:$0xf] }
   0x7   :  { %v979_v6 = vld [vmem:[%s1334_s1 + $0x4] sm:$0xf0]  ;;  %v777_v7 = vor.u32 %v980_v2, %v774_v4  ;;  %v978_v8 = vld [vmem:[%s1334_s1 + $0x4] sm:$0xf]  ;;  %v766_v9 = vld [vmem:[%s1334_s1 + $0x8] sm:$0xf0] }
   0x8   :  { %104 = vmatpush.bf16.msra.mxu0 %v773_v3  ;;  %v765_v10 = vor.u32 %v979_v6, %v764_v5  ;;  %v43_v11 = vld [vmem:[%s1333_s0] sm:$0xff]  ;;  %v44_v12 = vld [vmem:[%s1333_s0 + $0x8] sm:$0xff]  ;;  %v769_v13 = vor.u32 %v978_v8, %v766_v9  ;;  %vm85_vm0 = vcmask 261120   ;;  %v45_v15 = vld [vmem:[%s1333_s0 + $0x10] sm:$0xff]  ;;  %vm748_vm1 = vcmask 7168  }
   0x9   :  { %133 = vmatpush.bf16.msra.mxu1 %v777_v7  ;;  %v51_v14 = vpack.c.bf16 %v44_v12, %v43_v11  ;;  %v46_v16 = vld [vmem:[%s1333_s0 + $0x18] sm:$0xff]  ;;  %v996_v18 = vld [vmem:[#allocation2 + $0x74] sm:$0xf]  ;;  %v994_v23 = vld [vmem:[#allocation2 + $0x64] sm:$0xf] }
   0xa   :  { %v52_v17 = vpack.c.bf16 %v46_v16, %v45_v15  ;;  %v846_v19 = vld [vmem:[#allocation2 + $0x78] sm:$0xf0]  ;;  %v1012_v20 = vld [vmem:[#allocation2 + $0xf4] sm:$0xf]  ;;  %v838_v24 = vld [vmem:[#allocation2 + $0x68] sm:$0xf0] }
   0xb   :  { %v849_v21 = vor.u32 %v996_v18, %v846_v19  ;;  %v910_v22 = vld [vmem:[#allocation2 + $0xf8] sm:$0xf0]  ;;  %v1010_v26 = vld [vmem:[#allocation2 + $0xe4] sm:$0xf]  ;;  %v902_v27 = vld [vmem:[#allocation2 + $0xe8] sm:$0xf0]  ;;  %v841_v28 = vor.u32 %v994_v23, %v838_v24 }
   0xc   :  { %105 = vmatpush.bf16.msra.mxu0 %v765_v10  ;;  %v913_v25 = vor.u32 %v1012_v20, %v910_v22  ;;  %v992_v29 = vld [vmem:[#allocation2 + $0x54] sm:$0xf]  ;;  %v830_v30 = vld [vmem:[#allocation2 + $0x58] sm:$0xf0]  ;;  %v905_v31 = vor.u32 %v1010_v26, %v902_v27  ;;  %v844_v34 = vld [vmem:[#allocation2 + $0x70] sm:$0xf] }
   0xd   :  { %134 = vmatpush.bf16.msra.mxu1 %v769_v13  ;;  %v1008_v32 = vld [vmem:[#allocation2 + $0xd4] sm:$0xf]  ;;  %v894_v33 = vld [vmem:[#allocation2 + $0xd8] sm:$0xf0]  ;;  %v997_v35 = vld [vmem:[#allocation2 + $0x74] sm:$0xf0]  ;;  %v833_v41 = vor.u32 %v992_v29, %v830_v30 }
   0xe   :  { %v908_v36 = vld [vmem:[#allocation2 + $0xf0] sm:$0xf]  ;;  %v1013_v37 = vld [vmem:[#allocation2 + $0xf4] sm:$0xf0]  ;;  %v845_v38 = vor.u32 %v997_v35, %v844_v34  ;;  %v836_v40 = vld [vmem:[#allocation2 + $0x60] sm:$0xf]  ;;  %v897_v47 = vor.u32 %v1008_v32, %v894_v33 }
   0xf   :  { %778 = vmatmul.msk.bf16.vlgmr.msra.gmra.mxu0 %vm85_vm0, %v51_v14  ;;  %v909_v39 = vor.u32 %v1013_v37, %v908_v36  ;;  %v995_v42 = vld [vmem:[#allocation2 + $0x64] sm:$0xf0]  ;;  %v900_v43 = vld [vmem:[#allocation2 + $0xe0] sm:$0xf]  ;;  %v990_v49 = vld [vmem:[#allocation2 + $0x44] sm:$0xf] }
  0x10   :  { %782 = vmatmul.msk.bf16.vlgmr.msra.gmra.mxu1 %vm85_vm0, %v51_v14  ;;  %436 = vmatpush.bf16.msrb.mxu0 %v849_v21  ;;  %v1011_v44 = vld [vmem:[#allocation2 + $0xe4] sm:$0xf0]  ;;  %v47_v45 = vld [vmem:[%s1333_s0 + $0x20] sm:$0xff]  ;;  %v837_v48 = vor.u32 %v995_v42, %v836_v40  ;;  %v822_v50 = vld [vmem:[#allocation2 + $0x48] sm:$0xf0] }
  0x11   :  { %465 = vmatpush.bf16.msrb.mxu1 %v913_v25  ;;  %v48_v46 = vld [vmem:[%s1333_s0 + $0x28] sm:$0xff]  ;;  %378 = vmatpush.bf16.msra.mxu2 %v845_v38  ;;  %v1006_v51 = vld [vmem:[#allocation2 + $0xc4] sm:$0xf]  ;;  %v901_v52 = vor.u32 %v1011_v44, %v900_v43  ;;  %v828_v54 = vld [vmem:[#allocation2 + $0x50] sm:$0xf]  ;;  %v825_v59 = vor.u32 %v990_v49, %v822_v50 }
  0x12   :  { %407 = vmatpush.bf16.msra.mxu3 %v909_v39  ;;  %v886_v53 = vld [vmem:[#allocation2 + $0xc8] sm:$0xf0]  ;;  %v993_v55 = vld [vmem:[#allocation2 + $0x54] sm:$0xf0]  ;;  %v53_v56 = vpack.c.bf16 %v48_v46, %v47_v45  ;;  %v892_v57 = vld [vmem:[#allocation2 + $0xd0] sm:$0xf] }
  0x13   :  { %v1009_v58 = vld [vmem:[#allocation2 + $0xd4] sm:$0xf0]  ;;  %v889_v60 = vor.u32 %v1006_v51, %v886_v53  ;;  %v988_v61 = vld [vmem:[#allocation2 + $0x34] sm:$0xf]  ;;  %v814_v62 = vld [vmem:[#allocation2 + $0x38] sm:$0xf0]  ;;  %v829_v63 = vor.u32 %v993_v55, %v828_v54 }
  0x14   :  { %437 = vmatpush.bf16.msrb.mxu0 %v841_v28  ;;  %v1004_v0 = vld [vmem:[#allocation2 + $0xb4] sm:$0xf]  ;;  %v893_v1 = vor.u32 %v1009_v58, %v892_v57  ;;  %v878_v2 = vld [vmem:[#allocation2 + $0xb8] sm:$0xf0]  ;;  %v820_v3 = vld [vmem:[#allocation2 + $0x40] sm:$0xf]  ;;  %v817_v7 = vor.u32 %v988_v61, %v814_v62 }
  0x15   :  { %466 = vmatpush.bf16.msrb.mxu1 %v905_v31  ;;  %379 = vmatpush.bf16.msra.mxu2 %v837_v48  ;;  %v991_v4 = vld [vmem:[#allocation2 + $0x44] sm:$0xf0]  ;;  %v884_v5 = vld [vmem:[#allocation2 + $0xc0] sm:$0xf]  ;;  %v881_v8 = vor.u32 %v1004_v0, %v878_v2  ;;  %v986_v10 = vld [vmem:[#allocation2 + $0x24] sm:$0xf] }
  0x16   :  { %408 = vmatpush.bf16.msra.mxu3 %v901_v52  ;;  %v1007_v6 = vld [vmem:[#allocation2 + $0xc4] sm:$0xf0]  ;;  %v821_v9 = vor.u32 %v991_v4, %v820_v3  ;;  %v806_v11 = vld [vmem:[#allocation2 + $0x28] sm:$0xf0]  ;;  %v49_v14 = vld [vmem:[%s1333_s0 + $0x30] sm:$0xff] }
  0x17   :  { %v885_v12 = vor.u32 %v1007_v6, %v884_v5  ;;  %v809_v13 = vor.u32 %v986_v10, %v806_v11  ;;  %v50_v15 = vld [vmem:[%s1333_s0 + $0x38] sm:$0xff]  ;;  %v876_v19 = vld [vmem:[#allocation2 + $0xb0] sm:$0xf]  ;;  %v1002_v23 = vld [vmem:[#allocation2 + $0xa4] sm:$0xf] }
  0x18   :  { %438 = vmatpush.bf16.msrb.mxu0 %v833_v41  ;;  %v54_v16 = vpack.c.bf16 %v50_v15, %v49_v14  ;;  %v989_v18 = vld [vmem:[#allocation2 + $0x34] sm:$0xf0]  ;;  %v870_v24 = vld [vmem:[#allocation2 + $0xa8] sm:$0xf0]  ;;  %v804_v26 = vld [vmem:[#allocation2 + $0x20] sm:$0xf] }
  0x19   :  { %467 = vmatpush.bf16.msrb.mxu1 %v897_v47  ;;  %380 = vmatpush.bf16.msra.mxu2 %v829_v63  ;;  %v1005_v21 = vld [vmem:[#allocation2 + $0xb4] sm:$0xf0]  ;;  %v873_v25 = vor.u32 %v1002_v23, %v870_v24  ;;  %v987_v27 = vld [vmem:[#allocation2 + $0x24] sm:$0xf0]  ;;  %v868_v28 = vld [vmem:[#allocation2 + $0xa0] sm:$0xf] }
  0x1a   :  { %409 = vmatpush.bf16.msra.mxu3 %v893_v1  ;;  %v877_v22 = vor.u32 %v1005_v21, %v876_v19  ;;  %v805_v29 = vor.u32 %v987_v27, %v804_v26  ;;  %v1003_v30 = vld [vmem:[#allocation2 + $0xa4] sm:$0xf0]  ;;  %v984_v31 = vld [vmem:[#allocation2 + $0x14] sm:$0xf]  ;;  %v798_v32 = vld [vmem:[#allocation2 + $0x18] sm:$0xf0] }
  0x1b   :  { %v869_v33 = vor.u32 %v1003_v30, %v868_v28  ;;  %v801_v34 = vor.u32 %v984_v31, %v798_v32  ;;  %v796_v35 = vld [vmem:[#allocation2 + $0x10] sm:$0xf]  ;;  %v985_v36 = vld [vmem:[#allocation2 + $0x14] sm:$0xf0]  ;;  %v1000_v40 = vld [vmem:[#allocation2 + $0x94] sm:$0xf] }
  0x1c   :  { %439 = vmatpush.bf16.msrb.mxu0 %v825_v59  ;;  %v860_v37 = vld [vmem:[#allocation2 + $0x90] sm:$0xf]  ;;  %v797_v38 = vor.u32 %v985_v36, %v796_v35  ;;  %v1001_v39 = vld [vmem:[#allocation2 + $0x94] sm:$0xf0]  ;;  %v862_v41 = vld [vmem:[#allocation2 + $0x98] sm:$0xf0] }
  0x1d   :  { %468 = vmatpush.bf16.msrb.mxu1 %v889_v60  ;;  %381 = vmatpush.bf16.msra.mxu2 %v821_v9  ;;  %v861_v42 = vor.u32 %v1001_v39, %v860_v37  ;;  %v865_v43 = vor.u32 %v1000_v40, %v862_v41  ;;  %v788_v44 = vld [vmem:[#allocation2] sm:$0xf]  ;;  %v983_v45 = vld [vmem:[#allocation2 + $0x4] sm:$0xf0]  ;;  %v982_v49 = vld [vmem:[#allocation2 + $0x4] sm:$0xf] }
  0x1e   :  { %410 = vmatpush.bf16.msra.mxu3 %v885_v12  ;;  %v852_v46 = vld [vmem:[#allocation2 + $0x80] sm:$0xf]  ;;  %v789_v47 = vor.u32 %v983_v45, %v788_v44  ;;  %v999_v48 = vld [vmem:[#allocation2 + $0x84] sm:$0xf0]  ;;  %v790_v50 = vld [vmem:[#allocation2 + $0x8] sm:$0xf0] }
  0x1f   :  { %779 = vmatmul.msk.bf16.gmra.mxu0 %vm85_vm0, %v52_v17  ;;  %v853_v51 = vor.u32 %v999_v48, %v852_v46  ;;  %v793_v52 = vor.u32 %v982_v49, %v790_v50  ;;  %v998_v53 = vld [vmem:[#allocation2 + $0x84] sm:$0xf]  ;;  %v854_v54 = vld [vmem:[#allocation2 + $0x88] sm:$0xf0]  ;;  %v1021_v24 = vld [vmem:[%s1338_s5 + $0x38] sm:$0xff] }
  0x20   :  { %783 = vmatmul.msk.bf16.gmra.mxu1 %vm85_vm0, %v52_v17  ;;  %440 = vmatpush.bf16.msrb.mxu0 %v817_v7  ;;  %v812_v17 = vld [vmem:[#allocation2 + $0x30] sm:$0xf]  ;;  %v857_v55 = vor.u32 %v998_v53, %v854_v54  ;;  %v1027_v30 = vld [vmem:[%s1338_s5 + $0x68] sm:$0xff]  ;;  %v1018_v37 = vld [vmem:[%s1338_s5 + $0x20] sm:$0xff] }
  0x21   :  { %469 = vmatpush.bf16.msrb.mxu1 %v881_v8  ;;  %v813_v20 = vor.u32 %v989_v18, %v812_v17  ;;  %v1020_v27 = vld [vmem:[%s1338_s5 + $0x30] sm:$0xff]  ;;  %v1017_v45 = vld [vmem:[%s1338_s5 + $0x18] sm:$0xff] }
  0x22   :  { %411 = vmatpush.bf16.msra.mxu3 %v877_v22  ;;  %v1028_v28 = vld [vmem:[%s1338_s5 + $0x70] sm:$0xff]  ;;  %v1025_v46 = vld [vmem:[%s1338_s5 + $0x58] sm:$0xff] }
  0x23   :  { %382 = vmatpush.bf16.msra.mxu2 %v813_v20  ;;  %v1016_v49 = vld [vmem:[%s1338_s5 + $0x10] sm:$0xff] }
  0x24   :  { %441 = vmatpush.bf16.msrb.mxu0 %v809_v13 }
  0x25   :  { %470 = vmatpush.bf16.msrb.mxu1 %v873_v25  ;;  %v1029_v25 = vld [vmem:[%s1338_s5 + $0x78] sm:$0xff] }
  0x26   :  { %412 = vmatpush.bf16.msra.mxu3 %v869_v33 }
  0x27   :  { %383 = vmatpush.bf16.msra.mxu2 %v805_v29  ;;  %v1019_v29 = vld [vmem:[%s1338_s5 + $0x28] sm:$0xff] }
  0x28   :  { %442 = vmatpush.bf16.msrb.mxu0 %v801_v34 }
  0x29   :  { %471 = vmatpush.bf16.msrb.mxu1 %v865_v43 }
  0x2a   :  { %413 = vmatpush.bf16.msra.mxu3 %v861_v42 }
  0x2b   :  { %384 = vmatpush.bf16.msra.mxu2 %v797_v38  ;;  %v1026_v38 = vld [vmem:[%s1338_s5 + $0x60] sm:$0xff] }
  0x2c   :  { %443 = vmatpush.bf16.msrb.mxu0 %v793_v52 }
  0x2d   :  { %472 = vmatpush.bf16.msrb.mxu1 %v857_v55 }
  0x2e   :  { %414 = vmatpush.bf16.msra.mxu3 %v853_v51 }
  0x2f   :  { %780 = vmatmul.msk.bf16.gmra.mxu0 %vm85_vm0, %v53_v56  ;;  %385 = vmatpush.bf16.msra.mxu2 %v789_v47 }
  0x30   :  { %784 = vmatmul.msk.bf16.gmra.mxu1 %vm85_vm0, %v53_v56  ;;  %v59_v56 = vld [vmem:[%s1335_s2] sm:$0x3] }
  0x31   :  { %v1197_v59 = vperm.slane %v59_v56, 0  ;;  %v1199_v60 = vperm.slane %v59_v56, 1 }
  0x32   :  { %679 = vmatpush.bf16.msrb.mxu3 %v1029_v25 }
  0x33   :  { %650 = vmatpush.bf16.msrb.mxu2 %v1021_v24 }
  0x36   :  { %680 = vmatpush.bf16.msrb.mxu3 %v1028_v28 }
  0x37   :  { %651 = vmatpush.bf16.msrb.mxu2 %v1020_v27 }
  0x3a   :  { %681 = vmatpush.bf16.msrb.mxu3 %v1027_v30 }
  0x3b   :  { %652 = vmatpush.bf16.msrb.mxu2 %v1019_v29 }
  0x3e   :  { %682 = vmatpush.bf16.msrb.mxu3 %v1026_v38 }
  0x3f   :  { %781 = vmatmul.msk.bf16.gmra.mxu0 %vm85_vm0, %v54_v16  ;;  %653 = vmatpush.bf16.msrb.mxu2 %v1018_v37 }
  0x40   :  { %785 = vmatmul.msk.bf16.gmra.mxu1 %vm85_vm0, %v54_v16 }
  0x42   :  { %683 = vmatpush.bf16.msrb.mxu3 %v1025_v46 }
  0x43   :  { %654 = vmatpush.bf16.msrb.mxu2 %v1017_v45 }
  0x47   :  { %655 = vmatpush.bf16.msrb.mxu2 %v1016_v49 }
  0x8c   :  { %v107_v57 = vpop.f32.mrf.mxu0 }
  0x8d   :  { %v136_v58 = vpop.f32.mrf.mxu1  ;;  %v108_v61 = vadd.f32 %v107_v57, %v1197_v59 }
  0x8e   :  { %v137_v62 = vadd.f32 %v136_v58, %v1199_v60 }
  0x8f   :  { %v156_v3 = vmax.f32 %v108_v61, 0.0 }
  0x90   :  { %v157_v5 = vmax.f32 %v137_v62, 0.0 }
  0x94   :  { %v109_v63 = vpop.f32.mrf.mxu0 }
  0x95   :  { %v110_v0 = vadd.f32 %v109_v63, %v1197_v59  ;;  %v138_v1 = vpop.f32.mrf.mxu1 }
  0x96   :  { %v139_v2 = vadd.f32 %v138_v1, %v1199_v60  ;;  %v1022_v1 = vld [vmem:[%s1338_s5 + $0x40] sm:$0xff] }
  0x97   :  { %v158_v4 = vmax.f32 %v110_v0, 0.0  ;;  %v1024_v0 = vld [vmem:[%s1338_s5 + $0x50] sm:$0xff] }
  0x98   :  { %v159_v6 = vmax.f32 %v139_v2, 0.0  ;;  %684 = vmatpush.bf16.msrb.mxu3 %v1024_v0  ;;  %v1014_v2 = vld [vmem:[%s1338_s5] sm:$0xff] }
  0x99   :  { %v172_v7 = vpack.c.bf16 %v158_v4, %v156_v3  ;;  %v212_v3 = vld [vmem:[%s1337_s4] sm:$0x3] }
  0x9a   :  { %v173_v8 = vpack.c.bf16 %v159_v6, %v157_v5  ;;  %v1268_v5 = vperm.slane %v212_v3, 1 }
  0x9b   :  { %386 = vmatmul.bf16.vlgmr.msra.gmra.mxu2 %v172_v7  ;;  %444 = vmatmul.bf16.vlgmr.msrb.gmra.mxu0 %v172_v7 }
  0x9c   :  { %415 = vmatmul.bf16.vlgmr.msra.gmra.mxu3 %v173_v8  ;;  %473 = vmatmul.bf16.vlgmr.msrb.gmra.mxu1 %v173_v8  ;;  %v112_v9 = vpop.f32.mrf.mxu0 }
  0x9d   :  { %v141_v10 = vpop.f32.mrf.mxu1  ;;  %v113_v11 = vadd.f32 %v112_v9, %v1197_v59  ;;  %v1271_v9 = vperm.slane %v212_v3, 0 }
  0x9e   :  { %v142_v12 = vadd.f32 %v141_v10, %v1199_v60 }
  0x9f   :  { %v160_v17 = vmax.f32 %v113_v11, 0.0 }
  0xa0   :  { %v161_v19 = vmax.f32 %v142_v12, 0.0 }
  0xa4   :  { %v114_v13 = vpop.f32.mrf.mxu0 }
  0xa5   :  { %v115_v14 = vadd.f32 %v114_v13, %v1197_v59  ;;  %v143_v15 = vpop.f32.mrf.mxu1 }
  0xa6   :  { %v144_v16 = vadd.f32 %v143_v15, %v1199_v60 }
  0xa7   :  { %v162_v18 = vmax.f32 %v115_v14, 0.0 }
  0xa8   :  { %v163_v20 = vmax.f32 %v144_v16, 0.0 }
  0xa9   :  { %v174_v21 = vpack.c.bf16 %v162_v18, %v160_v17 }
  0xaa   :  { %v175_v22 = vpack.c.bf16 %v163_v20, %v161_v19 }
  0xab   :  { %391 = vmatmul.bf16.gmra.mxu2 %v174_v21  ;;  %449 = vmatmul.bf16.gmra.mxu0 %v174_v21 }
  0xac   :  { %420 = vmatmul.bf16.gmra.mxu3 %v175_v22  ;;  %478 = vmatmul.bf16.gmra.mxu1 %v175_v22  ;;  %v117_v23 = vpop.f32.mrf.mxu0 }
  0xad   :  { %v146_v26 = vpop.f32.mrf.mxu1  ;;  %v118_v31 = vadd.f32 %v117_v23, %v1197_v59 }
  0xae   :  { %v147_v32 = vadd.f32 %v146_v26, %v1199_v60 }
  0xaf   :  { %v164_v39 = vmax.f32 %v118_v31, 0.0 }
  0xb0   :  { %v165_v41 = vmax.f32 %v147_v32, 0.0 }
  0xb4   :  { %v119_v33 = vpop.f32.mrf.mxu0 }
  0xb5   :  { %v120_v34 = vadd.f32 %v119_v33, %v1197_v59  ;;  %v148_v35 = vpop.f32.mrf.mxu1 }
  0xb6   :  { %v149_v36 = vadd.f32 %v148_v35, %v1199_v60 }
  0xb7   :  { %v166_v40 = vmax.f32 %v120_v34, 0.0 }
  0xb8   :  { %v167_v42 = vmax.f32 %v149_v36, 0.0 }
  0xb9   :  { %v176_v43 = vpack.c.bf16 %v166_v40, %v164_v39 }
  0xba   :  { %v177_v44 = vpack.c.bf16 %v167_v42, %v165_v41 }
  0xbb   :  { %396 = vmatmul.bf16.gmra.mxu2 %v176_v43  ;;  %454 = vmatmul.bf16.gmra.mxu0 %v176_v43 }
  0xbc   :  { %425 = vmatmul.bf16.gmra.mxu3 %v177_v44  ;;  %483 = vmatmul.bf16.gmra.mxu1 %v177_v44  ;;  %v122_v47 = vpop.f32.mrf.mxu0 }
  0xbd   :  { %v151_v48 = vpop.f32.mrf.mxu1  ;;  %v123_v50 = vadd.f32 %v122_v47, %v1197_v59 }
  0xbe   :  { %v152_v51 = vadd.f32 %v151_v48, %v1199_v60 }
  0xbf   :  { %v168_v56 = vmax.f32 %v123_v50, 0.0 }
  0xc0   :  { %v169_v58 = vmax.f32 %v152_v51, 0.0 }
  0xc4   :  { %v124_v52 = vpop.f32.mrf.mxu0 }
  0xc5   :  { %v125_v53 = vadd.f32 %v124_v52, %v1197_v59  ;;  %v153_v54 = vpop.f32.mrf.mxu1  ;;  %v1023_v59 = vld [vmem:[%s1338_s5 + $0x48] sm:$0xff] }
  0xc6   :  { %v154_v55 = vadd.f32 %v153_v54, %v1199_v60  ;;  %v1015_v60 = vld [vmem:[%s1338_s5 + $0x8] sm:$0xff]  ;;  %685 = vmatpush.bf16.msrb.mxu3 %v1023_v59 }
  0xc7   :  { %v170_v57 = vmax.f32 %v125_v53, 0.0  ;;  %656 = vmatpush.bf16.msrb.mxu2 %v1015_v60 }
  0xc8   :  { %v171_v61 = vmax.f32 %v154_v55, 0.0 }
  0xc9   :  { %v178_v62 = vpack.c.bf16 %v170_v57, %v168_v56 }
  0xca   :  { %v179_v63 = vpack.c.bf16 %v171_v61, %v169_v58  ;;  %686 = vmatpush.bf16.msrb.mxu3 %v1022_v1 }
  0xcb   :  { %401 = vmatmul.bf16.gmra.mxu2 %v178_v62  ;;  %459 = vmatmul.bf16.gmra.mxu0 %v178_v62 }
  0xcc   :  { %430 = vmatmul.bf16.gmra.mxu3 %v179_v63  ;;  %488 = vmatmul.bf16.gmra.mxu1 %v179_v63 }
  0xcd   :  { %657 = vmatpush.bf16.msrb.mxu2 %v1014_v2 }
 0x118   :  { %v445_v4 = vpop.f32.mrf.mxu0 }
 0x119   :  { %v474_v6 = vpop.f32.mrf.mxu1  ;;  %v446_v7 = vadd.f32 %v445_v4, %v1268_v5 }
 0x11b   :  { %v475_v12 = vadd.f32 %v474_v6, %v446_v7 }
 0x11d   :  { %v495_v17 = vmax.f32 %v475_v12, 0.0 }
 0x11e   :  { %v387_v8 = vpop.f32.mrf.mxu2 }
 0x11f   :  { %v416_v10 = vpop.f32.mrf.mxu3  ;;  %v388_v15 = vadd.f32 %v387_v8, %v1271_v9 }
 0x120   :  { %v447_v11 = vpop.f32.mrf.mxu0 }
 0x121   :  { %v448_v13 = vadd.f32 %v447_v11, %v1268_v5  ;;  %v476_v14 = vpop.f32.mrf.mxu1  ;;  %v417_v20 = vadd.f32 %v416_v10, %v388_v15 }
 0x123   :  { %v477_v16 = vadd.f32 %v476_v14, %v448_v13  ;;  %v494_v27 = vmax.f32 %v417_v20, 0.0 }
 0x125   :  { %v497_v18 = vmax.f32 %v477_v16, 0.0 }
 0x126   :  { %v389_v19 = vpop.f32.mrf.mxu2 }
 0x127   :  { %v511_v21 = vpack.c.bf16 %v497_v18, %v495_v17  ;;  %v390_v22 = vadd.f32 %v389_v19, %v1271_v9  ;;  %v418_v23 = vpop.f32.mrf.mxu3 }
 0x128   :  { %v450_v24 = vpop.f32.mrf.mxu0 }
 0x129   :  { %v419_v25 = vadd.f32 %v418_v23, %v390_v22  ;;  %v479_v26 = vpop.f32.mrf.mxu1  ;;  %687 = vmatmul.bf16.vlgmr.msrb.gmra.mxu3 %v511_v21  ;;  %v451_v30 = vadd.f32 %v450_v24, %v1268_v5 }
 0x12b   :  { %v496_v28 = vmax.f32 %v419_v25, 0.0  ;;  %v480_v34 = vadd.f32 %v479_v26, %v451_v30 }
 0x12d   :  { %v510_v29 = vpack.c.bf16 %v496_v28, %v494_v27  ;;  %v499_v39 = vmax.f32 %v480_v34, 0.0 }
 0x12e   :  { %v392_v31 = vpop.f32.mrf.mxu2 }
 0x12f   :  { %v421_v32 = vpop.f32.mrf.mxu3  ;;  %658 = vmatmul.bf16.vlgmr.msrb.gmra.mxu2 %v510_v29  ;;  %v393_v37 = vadd.f32 %v392_v31, %v1271_v9 }
 0x130   :  { %v452_v33 = vpop.f32.mrf.mxu0 }
 0x131   :  { %v453_v35 = vadd.f32 %v452_v33, %v1268_v5  ;;  %v481_v36 = vpop.f32.mrf.mxu1  ;;  %v422_v42 = vadd.f32 %v421_v32, %v393_v37 }
 0x133   :  { %v482_v38 = vadd.f32 %v481_v36, %v453_v35  ;;  %v498_v49 = vmax.f32 %v422_v42, 0.0 }
 0x135   :  { %v501_v40 = vmax.f32 %v482_v38, 0.0 }
 0x136   :  { %v394_v41 = vpop.f32.mrf.mxu2 }
 0x137   :  { %v395_v43 = vadd.f32 %v394_v41, %v1271_v9  ;;  %v423_v44 = vpop.f32.mrf.mxu3  ;;  %v513_v45 = vpack.c.bf16 %v501_v40, %v499_v39 }
 0x138   :  { %v455_v46 = vpop.f32.mrf.mxu0 }
 0x139   :  { %v424_v47 = vadd.f32 %v423_v44, %v395_v43  ;;  %v484_v48 = vpop.f32.mrf.mxu1  ;;  %692 = vmatmul.bf16.gmra.mxu3 %v513_v45  ;;  %v456_v51 = vadd.f32 %v455_v46, %v1268_v5 }
 0x13b   :  { %v500_v50 = vmax.f32 %v424_v47, 0.0  ;;  %v485_v56 = vadd.f32 %v484_v48, %v456_v51 }
 0x13d   :  { %v512_v52 = vpack.c.bf16 %v500_v50, %v498_v49  ;;  %v503_v63 = vmax.f32 %v485_v56, 0.0 }
 0x13e   :  { %v397_v53 = vpop.f32.mrf.mxu2 }
 0x13f   :  { %v426_v54 = vpop.f32.mrf.mxu3  ;;  %663 = vmatmul.bf16.gmra.mxu2 %v512_v52  ;;  %v398_v61 = vadd.f32 %v397_v53, %v1271_v9 }
 0x140   :  { %v457_v55 = vpop.f32.mrf.mxu0 }
 0x141   :  { %v458_v57 = vadd.f32 %v457_v55, %v1268_v5  ;;  %v486_v58 = vpop.f32.mrf.mxu1  ;;  %v427_v60 = vadd.f32 %v426_v54, %v398_v61 }
 0x143   :  { %v487_v62 = vadd.f32 %v486_v58, %v458_v57  ;;  %v502_v8 = vmax.f32 %v427_v60, 0.0 }
 0x145   :  { %v505_v0 = vmax.f32 %v487_v62, 0.0 }
 0x146   :  { %v399_v59 = vpop.f32.mrf.mxu2 }
 0x147   :  { %v400_v1 = vadd.f32 %v399_v59, %v1271_v9  ;;  %v428_v2 = vpop.f32.mrf.mxu3  ;;  %v515_v3 = vpack.c.bf16 %v505_v0, %v503_v63 }
 0x148   :  { %v460_v4 = vpop.f32.mrf.mxu0 }
 0x149   :  { %v429_v6 = vadd.f32 %v428_v2, %v400_v1  ;;  %v489_v7 = vpop.f32.mrf.mxu1  ;;  %697 = vmatmul.bf16.gmra.mxu3 %v515_v3  ;;  %v461_v11 = vadd.f32 %v460_v4, %v1268_v5 }
 0x14b   :  { %v504_v10 = vmax.f32 %v429_v6, 0.0  ;;  %v490_v16 = vadd.f32 %v489_v7, %v461_v11 }
 0x14d   :  { %v514_v12 = vpack.c.bf16 %v504_v10, %v502_v8  ;;  %v507_v21 = vmax.f32 %v490_v16, 0.0 }
 0x14e   :  { %v402_v13 = vpop.f32.mrf.mxu2 }
 0x14f   :  { %v431_v14 = vpop.f32.mrf.mxu3  ;;  %668 = vmatmul.bf16.gmra.mxu2 %v514_v12  ;;  %v403_v19 = vadd.f32 %v402_v13, %v1271_v9 }
 0x150   :  { %v462_v15 = vpop.f32.mrf.mxu0 }
 0x151   :  { %v463_v17 = vadd.f32 %v462_v15, %v1268_v5  ;;  %v491_v18 = vpop.f32.mrf.mxu1  ;;  %v432_v24 = vadd.f32 %v431_v14, %v403_v19  ;;  %v1291_v5 = vld [vmem:[%s1339_s6] ss:$0 sm:$0xff] }
 0x153   :  { %v492_v20 = vadd.f32 %v491_v18, %v463_v17  ;;  %v506_v29 = vmax.f32 %v432_v24, 0.0 }
 0x155   :  { %v509_v22 = vmax.f32 %v492_v20, 0.0 }
 0x156   :  { %v404_v23 = vpop.f32.mrf.mxu2 }
 0x157   :  { %v405_v25 = vadd.f32 %v404_v23, %v1271_v9  ;;  %v517_v26 = vpack.c.bf16 %v509_v22, %v507_v21  ;;  %v433_v27 = vpop.f32.mrf.mxu3 }
 0x159   :  { %v434_v28 = vadd.f32 %v433_v27, %v405_v25  ;;  %702 = vmatmul.bf16.gmra.mxu3 %v517_v26 }
 0x15b   :  { %v508_v30 = vmax.f32 %v434_v28, 0.0 }
 0x15d   :  { %v516_v31 = vpack.c.bf16 %v508_v30, %v506_v29 }
 0x15f   :  { %673 = vmatmul.bf16.gmra.mxu2 %v516_v31 }
 0x1ac   :  { %v688_v32 = vpop.f32.mrf.mxu3 }
 0x1b2   :  { %v659_v33 = vpop.f32.mrf.mxu2 }
 0x1b3   :  { %v660_v34 = vadd.f32 %v1291_v5, %v659_v33 }
 0x1b4   :  { %v690_v35 = vpop.f32.mrf.mxu3 }
 0x1b5   :  { %v689_v36 = vadd.f32 %v688_v32, %v660_v34 }
 0x1b7   :  { %v708_v9 = vsub.f32 0.0, %v689_v36 }
 0x1b9   :  { %v716_v37 = vmul.f32 1.442695, %v708_v9 }
 0x1ba   :  { %v661_v38 = vpop.f32.mrf.mxu2 }
 0x1bb   :  { %1034 = vpow2.f32 %v716_v37  ;;  %v662_v39 = vadd.f32 %v1291_v5, %v661_v38 }
 0x1bc   :  { %v693_v40 = vpop.f32.mrf.mxu3 }
 0x1bd   :  { %v691_v41 = vadd.f32 %v690_v35, %v662_v39 }
 0x1bf   :  { %v709_v42 = vsub.f32 0.0, %v691_v41 }
 0x1c1   :  { %v1035_v43 = vpop.eup %1034  ;;  %v718_v44 = vmul.f32 1.442695, %v709_v42 }
 0x1c2   :  { %v732_v45 = vadd.f32 1.0, %v1035_v43  ;;  %v664_v46 = vpop.f32.mrf.mxu2 }
 0x1c3   :  { %1036 = vpow2.f32 %v718_v44  ;;  %v665_v47 = vadd.f32 %v1291_v5, %v664_v46 }
 0x1c4   :  { %1038 = vrcp.f32 %v732_v45  ;;  %v695_v48 = vpop.f32.mrf.mxu3 }
 0x1c5   :  { %v694_v49 = vadd.f32 %v693_v40, %v665_v47 }
 0x1c7   :  { %v710_v50 = vsub.f32 0.0, %v694_v49 }
 0x1c9   :  { %v1037_v51 = vpop.eup %1036  ;;  %v720_v52 = vmul.f32 1.442695, %v710_v50 }
 0x1ca   :  { %v1039_v53 = vpop.eup %1038  ;;  %v733_v54 = vadd.f32 1.0, %v1037_v51  ;;  %v666_v55 = vpop.f32.mrf.mxu2 }
 0x1cb   :  { %749 = vst.msk [vmem:[%s1340_s7] sm:$0xff] %vm748_vm1, %v1039_v53  ;;  %1040 = vpow2.f32 %v720_v52  ;;  %v667_v56 = vadd.f32 %v1291_v5, %v666_v55 }
 0x1cc   :  { %1042 = vrcp.f32 %v733_v54  ;;  %v698_v58 = vpop.f32.mrf.mxu3 }
 0x1cd   :  { %v696_v57 = vadd.f32 %v695_v48, %v667_v56 }
 0x1cf   :  { %v711_v61 = vsub.f32 0.0, %v696_v57 }
 0x1d1   :  { %v1041_v62 = vpop.eup %1040  ;;  %v722_v63 = vmul.f32 1.442695, %v711_v61 }
 0x1d2   :  { %v1043_v0 = vpop.eup %1042  ;;  %v734_v59 = vadd.f32 1.0, %v1041_v62  ;;  %v669_v60 = vpop.f32.mrf.mxu2 }
 0x1d3   :  { %750 = vst.msk [vmem:[%s1340_s7 + $0x8] sm:$0xff] %vm748_vm1, %v1043_v0  ;;  %1044 = vpow2.f32 %v722_v63  ;;  %v670_v1 = vadd.f32 %v1291_v5, %v669_v60 }
 0x1d4   :  { %1046 = vrcp.f32 %v734_v59  ;;  %v700_v4 = vpop.f32.mrf.mxu3 }
 0x1d5   :  { %v699_v2 = vadd.f32 %v698_v58, %v670_v1 }
 0x1d7   :  { %v712_v3 = vsub.f32 0.0, %v699_v2 }
 0x1d9   :  { %v1045_v6 = vpop.eup %1044  ;;  %v724_v7 = vmul.f32 1.442695, %v712_v3 }
 0x1da   :  { %v1047_v8 = vpop.eup %1046  ;;  %v735_v10 = vadd.f32 1.0, %v1045_v6  ;;  %v671_v11 = vpop.f32.mrf.mxu2 }
 0x1db   :  { %751 = vst.msk [vmem:[%s1340_s7 + $0x10] sm:$0xff] %vm748_vm1, %v1047_v8  ;;  %1048 = vpow2.f32 %v724_v7  ;;  %v672_v12 = vadd.f32 %v1291_v5, %v671_v11 }
 0x1dc   :  { %1050 = vrcp.f32 %v735_v10  ;;  %v703_v19 = vpop.f32.mrf.mxu3 }
 0x1dd   :  { %v701_v13 = vadd.f32 %v700_v4, %v672_v12 }
 0x1df   :  { %v713_v14 = vsub.f32 0.0, %v701_v13 }
 0x1e1   :  { %v1049_v15 = vpop.eup %1048  ;;  %v726_v16 = vmul.f32 1.442695, %v713_v14 }
 0x1e2   :  { %v1051_v17 = vpop.eup %1050  ;;  %v736_v18 = vadd.f32 1.0, %v1049_v15  ;;  %v674_v20 = vpop.f32.mrf.mxu2 }
 0x1e3   :  { %752 = vst.msk [vmem:[%s1340_s7 + $0x18] sm:$0xff] %vm748_vm1, %v1051_v17  ;;  %1052 = vpow2.f32 %v726_v16  ;;  %v675_v21 = vadd.f32 %v1291_v5, %v674_v20 }
 0x1e4   :  { %1054 = vrcp.f32 %v736_v18  ;;  %v705_v30 = vpop.f32.mrf.mxu3 }
 0x1e5   :  { %v704_v22 = vadd.f32 %v703_v19, %v675_v21 }
 0x1e7   :  { %v714_v23 = vsub.f32 0.0, %v704_v22 }
 0x1e9   :  { %v1053_v24 = vpop.eup %1052  ;;  %v728_v25 = vmul.f32 1.442695, %v714_v23 }
 0x1ea   :  { %v1055_v26 = vpop.eup %1054  ;;  %v737_v27 = vadd.f32 1.0, %v1053_v24  ;;  %v676_v28 = vpop.f32.mrf.mxu2 }
 0x1eb   :  { %753 = vst.msk [vmem:[%s1340_s7 + $0x20] sm:$0xff] %vm748_vm1, %v1055_v26  ;;  %1056 = vpow2.f32 %v728_v25  ;;  %v677_v29 = vadd.f32 %v1291_v5, %v676_v28 }
 0x1ec   :  { %1058 = vrcp.f32 %v737_v27 }
 0x1ed   :  { %v706_v31 = vadd.f32 %v705_v30, %v677_v29 }
 0x1ef   :  { %v715_v32 = vsub.f32 0.0, %v706_v31 }
 0x1f1   :  { %v1057_v33 = vpop.eup %1056  ;;  %v730_v34 = vmul.f32 1.442695, %v715_v32 }
 0x1f2   :  { %v1059_v35 = vpop.eup %1058  ;;  %v738_v36 = vadd.f32 1.0, %v1057_v33 }
 0x1f3   :  { %754 = vst.msk [vmem:[%s1340_s7 + $0x28] sm:$0xff] %vm748_vm1, %v1059_v35  ;;  %1060 = vpow2.f32 %v730_v34 }
 0x1f4   :  { %1062 = vrcp.f32 %v738_v36 }
 0x1f9   :  { %v1061_v9 = vpop.eup %1060 }
 0x1fa   :  { %v1063_v37 = vpop.eup %1062  ;;  %v739_v38 = vadd.f32 1.0, %v1061_v9 }
 0x1fb   :  { %755 = vst.msk [vmem:[%s1340_s7 + $0x30] sm:$0xff] %vm748_vm1, %v1063_v37 }
 0x1fc   :  { %1064 = vrcp.f32 %v739_v38 }
 0x202   :  { %v1065_v5 = vpop.eup %1064 }
 0x203   :  { %756 = vst.msk [vmem:[%s1340_s7 + $0x38] sm:$0xff] %vm748_vm1, %v1065_v5 }
 0x204   :  { %761 = vsyncpa [#allocation3], 1 }

</bundles_post_ra>
